<compile_context>
chip_gen: v5e
topology: v5e:2x2
jax: 0.10.0
libtpu: 0.0.40
codegen_flags: <defaults>
</compile_context>

<pallas_src>
import jax
import jax.numpy as jnp
from jax.experimental import pallas as pl
from jax.experimental.pallas import tpu as pltpu


def _softpool_kernel(xw_ref, o_ref):
    """xw_ref: (K*K, TBC, TS) input block; o_ref: (TBC, TS) output block."""
    kk = xw_ref.shape[0]

    # Per-window max; exactly cancels in the ratio but keeps exp in range.
    m = xw_ref[0]
    for r in range(1, kk):
        m = jnp.maximum(m, xw_ref[r])

    # Window reduction over the leading (non-vreg) axis: kk-1 VPU adds.
    # exp / mul stay in the input dtype (bf16 fast on v6e/v7x); accumulate f32.
    num = jnp.zeros(o_ref.shape, jnp.float32)
    den = jnp.zeros(o_ref.shape, jnp.float32)
    for r in range(kk):
        xr = xw_ref[r]
        er = jnp.exp(xr - m)                       # EUP transcendental
        num = num + (er * xr).astype(jnp.float32)
        den = den + er.astype(jnp.float32)

    # Approx EUP reciprocal + one Newton-Raphson step (den is in [1, kk]).
    inv = pl.reciprocal(den, approx=True)
    inv = inv * (2.0 - den * inv)
    o_ref[...] = (num * inv).astype(o_ref.dtype)


def _vmem_limit_bytes():
    """Scoped-VMEM limit budgeted from the local chip's physical VMEM."""
    try:
        phys = pltpu.get_tpu_info().vmem_capacity_bytes
    except Exception:
        phys = 64 * 1024 * 1024  # conservative fallback (v7x physical size)
    return min(phys // 2, 64 * 1024 * 1024)


def _round_up(x, m):
    return ((x + m - 1) // m) * m


def _choose_tiles(bc, s, kk, in_itemsize, out_itemsize, vmem_limit):
    """Pick (TBC, TS): largest double-buffered blocks that fit comfortably."""
    budget = vmem_limit // 3  # headroom on top of double-buffering

    # Spatial (lane) tile: full Ho*Wo when modest, else a big multiple of 128.
    max_ts = 8192
    ts = s if s <= max_ts else max_ts

    bytes_per_row = 2 * (kk * in_itemsize + out_itemsize) * ts  # x2 dbl-buffer
    tbc = max(1, budget // bytes_per_row)
    if bc <= 8:
        tbc = bc                        # block dim == full array dim: allowed
    else:
        tbc = min(tbc, bc)
        tbc = max(8, (tbc // 8) * 8)    # keep sublane dim 8-aligned

    # Keep >= 2 grid steps when possible so both v7x TensorCores get work.
    n_bc = -(-bc // tbc)
    n_sp = -(-s // ts)
    if n_bc * n_sp == 1 and bc >= 16:
        tbc = min(bc, _round_up(-(-bc // 2), 8))
    return tbc, ts


def soft_pooling_2d(x, kernel_size=2):
    """SoftPooling2D forward.  x: (B, C, H, W) NCHW -> (B, C, H//K, W//K)."""
    k = int(kernel_size)
    B, C, H, W = x.shape
    Ho, Wo = H // k, W // k
    if (Ho * k, Wo * k) != (H, W):       # PyTorch floor mode: drop remainder
        x = x[:, :, : Ho * k, : Wo * k]

    BC, S, KK = B * C, Ho * Wo, k * k
    itemsize = jnp.dtype(x.dtype).itemsize
    vmem_limit = _vmem_limit_bytes()
    TBC, TS = _choose_tiles(BC, S, KK, itemsize, itemsize, vmem_limit)
    n_bc, n_sp = -(-BC // TBC), -(-S // TS)

    # Lane-dense, window-axis-leading layout: (K*K, B*C, Ho*Wo).
    # (single XLA transpose; the reshapes on either side are free bitcasts)
    xw = x.reshape(B, C, Ho, k, Wo, k)
    xw = jnp.transpose(xw, (3, 5, 0, 1, 2, 4))
    xw = xw.reshape(KK, BC, S)

    cost = pl.CostEstimate(
        flops=3 * BC * S * KK,
        transcendentals=BC * S * KK + BC * S,
        bytes_accessed=(KK * BC * S + BC * S) * itemsize,
    )

    out = pl.pallas_call(
        _softpool_kernel,
        out_shape=jax.ShapeDtypeStruct((BC, S), x.dtype),
        grid_spec=pltpu.PrefetchScalarGridSpec(
            num_scalar_prefetch=0,
            grid=(n_bc, n_sp),
            in_specs=[pl.BlockSpec((KK, TBC, TS), lambda i, j: (0, i, j))],
            out_specs=pl.BlockSpec((TBC, TS), lambda i, j: (i, j)),
        ),
        compiler_params=pltpu.CompilerParams(
            dimension_semantics=("parallel", "parallel"),
            vmem_limit_bytes=vmem_limit,
        ),
        cost_estimate=cost,
    )(xw)

    return out.reshape(B, C, Ho, Wo)


def _soft_pooling_2d_ref(x, kernel_size=2):
    """Pure-JAX reference mirroring the torch module."""
    k = kernel_size
    B, C, H, W = x.shape
    Ho, Wo = H // k, W // k
    x = x[:, :, : Ho * k, : Wo * k]

    def avgpool(a):
        return a.reshape(B, C, Ho, k, Wo, k).mean(axis=(3, 5))

    x_exp = jnp.exp(x)
    return avgpool(x_exp * x) / avgpool(x_exp)


if __name__ == "__main__":
    key = jax.random.PRNGKey(0)
    B, C, H, W = 2, 4, 16, 16
    K = 2  # AvgPool2d kernel_size (stride defaults to kernel_size)
    x = jax.random.normal(key, (B, C, H, W), dtype=jnp.float32)

    out = soft_pooling_2d(x, kernel_size=K)
    out = jax.block_until_ready(out)

    ref = _soft_pooling_2d_ref(x, kernel_size=K)
    assert out.shape == (B, C, H // K, W // K)
    assert jnp.allclose(out, ref, atol=1e-5, rtol=1e-4), float(
        jnp.max(jnp.abs(out - ref)))

    print("KERNEL_OK")
</pallas_src>

<mosaic_0001>
module attributes {stable_mosaic.version = 11 : i64} {
  func.func @_softpool_kernel(%arg0: i32, %arg1: i32, %arg2: memref<4x8x64xf32, #tpu.memory_space<vmem>>, %arg3: memref<8x64xf32, #tpu.memory_space<vmem>>) attributes {dimension_semantics = [#tpu.dimension_semantics<parallel>, #tpu.dimension_semantics<parallel>], iteration_bounds = array<i64: 1, 1>, scalar_prefetch = 0 : i64, scratch_operands = 0 : i64, tpu.core_type = #tpu.core_type<tc>, window_params = [{transform_indices = @transform_0, window_bounds = array<i64: 4, 8, 64>}, {transform_indices = @transform_1, window_bounds = array<i64: 8, 64>}]} {
    %c0 = arith.constant 0 : index
    %c0_0 = arith.constant 0 : index
    %c0_1 = arith.constant 0 : index
    %0 = vector.load %arg2[%c0, %c0_0, %c0_1] : memref<4x8x64xf32, #tpu.memory_space<vmem>>, vector<1x8x64xf32>
    %1 = vector.shape_cast %0 : vector<1x8x64xf32> to vector<8x64xf32>
    %c1 = arith.constant 1 : index
    %c0_2 = arith.constant 0 : index
    %c0_3 = arith.constant 0 : index
    %2 = vector.load %arg2[%c1, %c0_2, %c0_3] : memref<4x8x64xf32, #tpu.memory_space<vmem>>, vector<1x8x64xf32>
    %3 = vector.shape_cast %2 : vector<1x8x64xf32> to vector<8x64xf32>
    %4 = arith.maximumf %1, %3 : vector<8x64xf32>
    %c2 = arith.constant 2 : index
    %c0_4 = arith.constant 0 : index
    %c0_5 = arith.constant 0 : index
    %5 = vector.load %arg2[%c2, %c0_4, %c0_5] : memref<4x8x64xf32, #tpu.memory_space<vmem>>, vector<1x8x64xf32>
    %6 = vector.shape_cast %5 : vector<1x8x64xf32> to vector<8x64xf32>
    %7 = arith.maximumf %4, %6 : vector<8x64xf32>
    %c3 = arith.constant 3 : index
    %c0_6 = arith.constant 0 : index
    %c0_7 = arith.constant 0 : index
    %8 = vector.load %arg2[%c3, %c0_6, %c0_7] : memref<4x8x64xf32, #tpu.memory_space<vmem>>, vector<1x8x64xf32>
    %9 = vector.shape_cast %8 : vector<1x8x64xf32> to vector<8x64xf32>
    %10 = arith.maximumf %7, %9 : vector<8x64xf32>
    %cst = arith.constant 0.000000e+00 : f32
    %11 = vector.broadcast %cst : f32 to vector<8x64xf32>
    %cst_8 = arith.constant 0.000000e+00 : f32
    %12 = vector.broadcast %cst_8 : f32 to vector<8x64xf32>
    %c0_9 = arith.constant 0 : index
    %c0_10 = arith.constant 0 : index
    %c0_11 = arith.constant 0 : index
    %13 = vector.load %arg2[%c0_9, %c0_10, %c0_11] : memref<4x8x64xf32, #tpu.memory_space<vmem>>, vector<1x8x64xf32>
    %14 = vector.shape_cast %13 : vector<1x8x64xf32> to vector<8x64xf32>
    %15 = arith.subf %14, %10 : vector<8x64xf32>
    %16 = math.exp %15 : vector<8x64xf32>
    %17 = arith.mulf %16, %14 : vector<8x64xf32>
    %18 = arith.addf %11, %17 : vector<8x64xf32>
    %19 = arith.addf %12, %16 : vector<8x64xf32>
    %c1_12 = arith.constant 1 : index
    %c0_13 = arith.constant 0 : index
    %c0_14 = arith.constant 0 : index
    %20 = vector.load %arg2[%c1_12, %c0_13, %c0_14] : memref<4x8x64xf32, #tpu.memory_space<vmem>>, vector<1x8x64xf32>
    %21 = vector.shape_cast %20 : vector<1x8x64xf32> to vector<8x64xf32>
    %22 = arith.subf %21, %10 : vector<8x64xf32>
    %23 = math.exp %22 : vector<8x64xf32>
    %24 = arith.mulf %23, %21 : vector<8x64xf32>
    %25 = arith.addf %18, %24 : vector<8x64xf32>
    %26 = arith.addf %19, %23 : vector<8x64xf32>
    %c2_15 = arith.constant 2 : index
    %c0_16 = arith.constant 0 : index
    %c0_17 = arith.constant 0 : index
    %27 = vector.load %arg2[%c2_15, %c0_16, %c0_17] : memref<4x8x64xf32, #tpu.memory_space<vmem>>, vector<1x8x64xf32>
    %28 = vector.shape_cast %27 : vector<1x8x64xf32> to vector<8x64xf32>
    %29 = arith.subf %28, %10 : vector<8x64xf32>
    %30 = math.exp %29 : vector<8x64xf32>
    %31 = arith.mulf %30, %28 : vector<8x64xf32>
    %32 = arith.addf %25, %31 : vector<8x64xf32>
    %33 = arith.addf %26, %30 : vector<8x64xf32>
    %c3_18 = arith.constant 3 : index
    %c0_19 = arith.constant 0 : index
    %c0_20 = arith.constant 0 : index
    %34 = vector.load %arg2[%c3_18, %c0_19, %c0_20] : memref<4x8x64xf32, #tpu.memory_space<vmem>>, vector<1x8x64xf32>
    %35 = vector.shape_cast %34 : vector<1x8x64xf32> to vector<8x64xf32>
    %36 = arith.subf %35, %10 : vector<8x64xf32>
    %37 = math.exp %36 : vector<8x64xf32>
    %38 = arith.mulf %37, %35 : vector<8x64xf32>
    %39 = arith.addf %32, %38 : vector<8x64xf32>
    %40 = arith.addf %33, %37 : vector<8x64xf32>
    %41 = tpu.reciprocal %40 {approx = true} : vector<8x64xf32> -> vector<8x64xf32>
    %42 = arith.mulf %40, %41 : vector<8x64xf32>
    %cst_21 = arith.constant 2.000000e+00 : f32
    %43 = vector.broadcast %cst_21 : f32 to vector<8x64xf32>
    %44 = arith.subf %43, %42 : vector<8x64xf32>
    %45 = arith.mulf %41, %44 : vector<8x64xf32>
    %46 = arith.mulf %39, %45 : vector<8x64xf32>
    %c0_22 = arith.constant 0 : index
    %c0_23 = arith.constant 0 : index
    %47 = vector.load %arg3[%c0_22, %c0_23] : memref<8x64xf32, #tpu.memory_space<vmem>>, vector<8x64xf32>
    tpu.vector_store %arg3[%c0_22, %c0_23], %46 {strides = array<i32>} : memref<8x64xf32, #tpu.memory_space<vmem>>, vector<8x64xf32>,
    return
  }
  func.func @transform_0(%arg0: i32, %arg1: i32) -> (i32, i32, i32) {
    %c0_i32 = arith.constant 0 : i32
    %c0_i32_0 = arith.constant 0 : i32
    return %c0_i32, %arg0, %arg1 : i32, i32, i32
  }
  func.func @transform_1(%arg0: i32, %arg1: i32) -> (i32, i32) {
    %c0_i32 = arith.constant 0 : i32
    return %arg0, %arg1 : i32, i32
  }
}

</mosaic_0001>

<bundles_post_ra>
// kernel: tpu_custom_call.1
= control target key start
LH: loop header
LB: loop body
LE: loop exit
PB: predicated region body
PF: predicated region fallthrough
CT: control target
= control target key end

     0   :  { %6 = vsyncpa [#allocation3], 0  ;;  %s169_s0 = inlined_call_operand.hbm [shape: f32[4,8,64], index: 0, kind: input, shape index: {}]   ;;  %s170_s1 = inlined_call_operand.hbm [shape: f32[8,64], index: 1, kind: output, shape index: {}]  }
   0x1   :  { %7 = vsyncpa [#allocation4], 0  ;;  %s12_s8 = sshll.u32 %s169_s0, 4  ;;  %s149_s9 = smov [#allocation2]   ;;  %s13_s8 = int_to_ptr.hbm [resolvable:$true] %s12_s8 }
   0x2   :  { %s14_s10 = sshll.u32 %s149_s9, 4  ;;  %s150_s11 = smov 128   ;;  %s15_s10 = int_to_ptr.vmem [resolvable:$true] %s14_s10 }
   0x3   :  { %s151_s12 = smov 8  }
   0x4   :  { %20 = dma.hbm_to_vmem [thread:$0]  %s13_s8, 512, %s15_s10, [#allocation3], %s150_s11, %s150_s11, %s151_s12  }
   0x5   :  { %145 = dma.done.wait [#allocation3], 512  }
   0x6   :  { %146 = vsyncadd [#allocation3], 4294966784  ;;  %v25_v0 = vld [vmem:[#allocation2] sm:$0xff]  ;;  %v27_v1 = vld [vmem:[#allocation2 + $0x8] sm:$0xff]  ;;  %s152_s0 = smov [#allocation5]   ;;  %s73_s16 = sshll.u32 %s170_s1, 4  ;;  %s74_s16 = int_to_ptr.hbm [resolvable:$true] %s73_s16 }
   0x7   :  { %v30_v2 = vld [vmem:[#allocation2 + $0x10] sm:$0xff]  ;;  %v28_v3 = vmax.f32 %v25_v0, %v27_v1  ;;  %v33_v4 = vld [vmem:[#allocation2 + $0x18] sm:$0xff]  ;;  %s71_s13 = sshll.u32 %s152_s0, 4  ;;  %vm64_vm0 = vcmask 523264   ;;  %s72_s13 = int_to_ptr.vmem [resolvable:$true] %s71_s13 }
   0x9   :  { %v31_v5 = vmax.f32 %v28_v3, %v30_v2 }
   0xb   :  { %v34_v6 = vmax.f32 %v31_v5, %v33_v4 }
   0xd   :  { %v35_v7 = vsub.f32 %v25_v0, %v34_v6  ;;  %v41_v8 = vsub.f32 %v27_v1, %v34_v6  ;;  %v47_v9 = vsub.f32 %v30_v2, %v34_v6  ;;  %v53_v10 = vsub.f32 %v33_v4, %v34_v6 }
   0xf   :  { %v36_v11 = vmul.f32 1.442695, %v35_v7  ;;  %v42_v12 = vmul.f32 1.442695, %v41_v8  ;;  %v48_v13 = vmul.f32 1.442695, %v47_v9 }
  0x10   :  { %v54_v14 = vmul.f32 1.442695, %v53_v10 }
  0x11   :  { %87 = vpow2.f32 %v36_v11 }
  0x12   :  { %89 = vpow2.f32 %v42_v12 }
  0x13   :  { %91 = vpow2.f32 %v48_v13 }
  0x14   :  { %93 = vpow2.f32 %v54_v14 }
  0x17   :  { %v88_v15 = vpop.eup %87 }
  0x18   :  { %v90_v16 = vpop.eup %89  ;;  %v38_v21 = vmul.f32 %v88_v15, %v25_v0 }
  0x19   :  { %v92_v17 = vpop.eup %91  ;;  %v46_v18 = vadd.f32 %v90_v16, %v88_v15  ;;  %v44_v22 = vmul.f32 %v90_v16, %v27_v1 }
  0x1a   :  { %v94_v19 = vpop.eup %93  ;;  %v50_v25 = vmul.f32 %v92_v17, %v30_v2 }
  0x1b   :  { %v52_v20 = vadd.f32 %v92_v17, %v46_v18  ;;  %v45_v24 = vadd.f32 %v44_v22, %v38_v21  ;;  %v56_v27 = vmul.f32 %v94_v19, %v33_v4 }
  0x1d   :  { %v58_v23 = vadd.f32 %v94_v19, %v52_v20  ;;  %v51_v26 = vadd.f32 %v50_v25, %v45_v24 }
  0x1f   :  { %95 = vrcp.f32 %v58_v23  ;;  %v57_v30 = vadd.f32 %v56_v27, %v51_v26 }
  0x25   :  { %v96_v28 = vpop.eup %95 }
  0x26   :  { %v60_v29 = vmul.f32 %v96_v28, %v58_v23 }
  0x28   :  { %v61_v31 = vsub.f32 2.0, %v60_v29 }
  0x2a   :  { %v62_v32 = vmul.f32 %v96_v28, %v61_v31 }
  0x2c   :  { %v63_v33 = vmul.f32 %v62_v32, %v57_v30 }
  0x2e   :  { %65 = vst.msk [vmem:[#allocation5] sm:$0xff] %vm64_vm0, %v63_v33 }
  0x2f   :  { %76 = dma.vmem_to_hbm [thread:$0]  %s72_s13, 128, %s74_s16, [#allocation4]  }
  0x30   :  { %147 = dma.done.wait [#allocation4], 128  }
  0x31   :  { %148 = vsyncadd [#allocation4], 4294967168 }
  0x32   :  { %81 = vsyncpa [#allocation3], 1 }
  0x33   :  { %82 = vsyncpa [#allocation4], 1 }

</bundles_post_ra>
